<compile_context>
chip_gen: v5e
topology: v5e:2x2
jax: 0.10.0
libtpu: 0.0.40
codegen_flags: <defaults>
</compile_context>

<pallas_src>
import jax
import jax.numpy as jnp
from jax.experimental import pallas as pl
from jax.experimental.pallas import tpu as pltpu

BN_EPS = 1e-5
SUBLANE = 8


def _latent_mapping_kernel(x_ref, w_ref, b_ref, o_ref):
    # x: (tb, D_in), w: (D_in, D_out), b: (1, D_out), o: (tb, D_out)
    x = x_ref[...]
    w = w_ref[...]

    # Fused fc1 + folded eval-mode BatchNorm: one MXU matmul (f32 acc) + bias.
    y = jnp.dot(x, w, preferred_element_type=jnp.float32) + b_ref[...]

    # Dropout: identity in eval mode.

    # l2norm over the feature axis: rsqrt (EUP slot) + multiply (VPU).
    inv_norm = jax.lax.rsqrt(jnp.sum(y * y, axis=1, keepdims=True))
    o_ref[...] = (y * inv_norm).astype(o_ref.dtype)


def _round_up(x, m):
    return ((x + m - 1) // m) * m


def _fold_bn(w_t, b, gamma, beta, running_mean, running_var):
    s = gamma * jax.lax.rsqrt(running_var + BN_EPS)       # (1, D_out)
    w_f = w_t * s                                          # (D_in, D_out)
    b_f = (b - running_mean) * s + beta                    # (1, D_out)
    return w_f, b_f


def _jnp_forward(x, w_f, b_f):
    y = x @ w_f + b_f
    return y * jax.lax.rsqrt(jnp.sum(y * y, axis=1, keepdims=True))


def _vmem_estimate_bytes(tb, d_in, d_out):
    # x + out tiles double-buffered, weight + bias double-buffered (default).
    return 4 * (2 * tb * (d_in + d_out) + 2 * (d_in * d_out + d_out))


def latent_mapping_video(x, w_t, b, gamma, beta, running_mean, running_var,
                         *, block_b=2048, min_pallas_rows=1024,
                         force_pallas=False):
    """x: (B, D_in) f32; w_t: (D_in, D_out) f32 (transposed PyTorch weight).
    b / gamma / beta / running_mean / running_var: (1, D_out) f32."""
    B, D_in = x.shape
    D_out = w_t.shape[1]

    # ---- Fold eval-mode BatchNorm1d (+ Linear bias) into weight / bias. ----
    w_f, b_f = _fold_bn(w_t, b, gamma, beta, running_mean, running_var)

    # Tiny problems: a single-tile Pallas launch costs more than the work.
    if B < min_pallas_rows and not force_pallas:
        return _jnp_forward(x, w_f, b_f)

    # ---- Batch tile: as large as fits VMEM; no host-side batch padding. ----
    vmem_budget = 48 << 20
    tb = max(SUBLANE, min(_round_up(block_b, SUBLANE), _round_up(B, SUBLANE)))
    while tb > SUBLANE and _vmem_estimate_bytes(tb, D_in, D_out) > vmem_budget:
        tb = max(SUBLANE, _round_up(tb // 2, SUBLANE))

    grid = (pl.cdiv(B, tb),)   # partial last block: stores are masked by Pallas

    vmem_limit = int(min(max(_vmem_estimate_bytes(tb, D_in, D_out) + (4 << 20),
                             32 << 20),
                         64 << 20))

    cost = pl.CostEstimate(
        flops=2 * B * D_in * D_out,
        transcendentals=B,
        bytes_accessed=4 * (B * D_in + D_in * D_out + D_out + B * D_out),
    )

    out = pl.pallas_call(
        _latent_mapping_kernel,
        out_shape=jax.ShapeDtypeStruct((B, D_out), jnp.float32),
        grid_spec=pltpu.PrefetchScalarGridSpec(
            num_scalar_prefetch=0,
            grid=grid,
            in_specs=[
                pl.BlockSpec((tb, D_in), lambda i: (i, 0)),     # x tile
                pl.BlockSpec((D_in, D_out), lambda i: (0, 0)),  # folded weight (resident)
                pl.BlockSpec((1, D_out), lambda i: (0, 0)),     # folded bias (resident)
            ],
            out_specs=pl.BlockSpec((tb, D_out), lambda i: (i, 0)),
        ),
        compiler_params=pltpu.CompilerParams(
            dimension_semantics=("parallel",),
            vmem_limit_bytes=vmem_limit,
        ),
        cost_estimate=cost,
    )(x, w_f, b_f)

    return out


def reference(x, w_t, b, gamma, beta, running_mean, running_var):
    y = x @ w_t + b
    y = (y - running_mean) * gamma / jnp.sqrt(running_var + BN_EPS) + beta
    return y / jnp.sqrt(jnp.sum(y * y, axis=1, keepdims=True))


if __name__ == "__main__":
    # mapping_layers = [D_in, D_out]
    B, D_in, D_out = 8, 32, 64

    key = jax.random.PRNGKey(0)
    kx, kw, kx2 = jax.random.split(key, 3)

    x = jax.random.normal(kx, (B, D_in), dtype=jnp.float32)

    # Xavier-uniform init for fc1.weight (PyTorch shape (D_out, D_in)), bias = 0.
    r = jnp.sqrt(6.0) / jnp.sqrt(float(D_in + D_out))
    w_pt = jax.random.uniform(kw, (D_out, D_in), minval=-r, maxval=r,
                              dtype=jnp.float32)
    w_t = jnp.transpose(w_pt)                        # (D_in, D_out)
    b = jnp.zeros((1, D_out), dtype=jnp.float32)

    # Freshly-initialized BatchNorm1d (eval): gamma=1, beta=0, mean=0, var=1.
    gamma = jnp.ones((1, D_out), dtype=jnp.float32)
    beta = jnp.zeros((1, D_out), dtype=jnp.float32)
    running_mean = jnp.zeros((1, D_out), dtype=jnp.float32)
    running_var = jnp.ones((1, D_out), dtype=jnp.float32)

    # 1) Single-tile Pallas path.
    out = latent_mapping_video(x, w_t, b, gamma, beta, running_mean,
                               running_var, force_pallas=True)
    out = jax.block_until_ready(out)
    ref = reference(x, w_t, b, gamma, beta, running_mean, running_var)
    assert out.shape == (B, D_out)
    assert jnp.allclose(out, ref, atol=1e-5, rtol=1e-5), "mismatch vs reference"
    assert jnp.allclose(jnp.sum(out * out, axis=1), 1.0, atol=1e-4)

    # 2) Multi-step grid with a masked partial last block (B=40, tb=16 -> 3 steps).
    B2 = 40
    x2 = jax.random.normal(kx2, (B2, D_in), dtype=jnp.float32)
    out2 = latent_mapping_video(x2, w_t, b, gamma, beta, running_mean,
                                running_var, block_b=16, force_pallas=True)
    out2 = jax.block_until_ready(out2)
    ref2 = reference(x2, w_t, b, gamma, beta, running_mean, running_var)
    assert out2.shape == (B2, D_out)
    assert jnp.allclose(out2, ref2, atol=1e-5, rtol=1e-5), "mismatch (partial block)"

    # 3) Small-batch jnp fallback matches too.
    out3 = latent_mapping_video(x, w_t, b, gamma, beta, running_mean, running_var)
    out3 = jax.block_until_ready(out3)
    assert jnp.allclose(out3, ref, atol=1e-5, rtol=1e-5), "mismatch (jnp fallback)"

    print("KERNEL_OK")
</pallas_src>

<mosaic_0001>
module attributes {stable_mosaic.version = 11 : i64} {
  func.func @_latent_mapping_kernel(%arg0: i32, %arg1: memref<8x32xf32, #tpu.memory_space<vmem>>, %arg2: memref<32x64xf32, #tpu.memory_space<vmem>>, %arg3: memref<1x64xf32, #tpu.memory_space<vmem>>, %arg4: memref<8x64xf32, #tpu.memory_space<vmem>>) attributes {dimension_semantics = [#tpu.dimension_semantics<parallel>], iteration_bounds = array<i64: 1>, scalar_prefetch = 0 : i64, scratch_operands = 0 : i64, tpu.core_type = #tpu.core_type<tc>, window_params = [{transform_indices = @transform_0, window_bounds = array<i64: 8, 32>}, {pipeline_mode = #tpu.pipeline_mode<synchronous>, transform_indices = @transform_1, window_bounds = array<i64: 32, 64>}, {pipeline_mode = #tpu.pipeline_mode<synchronous>, transform_indices = @transform_2, window_bounds = array<i64: 1, 64>}, {transform_indices = @transform_3, window_bounds = array<i64: 8, 64>}]} {
    %c0 = arith.constant 0 : index
    %c0_0 = arith.constant 0 : index
    %0 = vector.load %arg1[%c0, %c0_0] : memref<8x32xf32, #tpu.memory_space<vmem>>, vector<8x32xf32>
    %c0_1 = arith.constant 0 : index
    %c0_2 = arith.constant 0 : index
    %1 = vector.load %arg2[%c0_1, %c0_2] : memref<32x64xf32, #tpu.memory_space<vmem>>, vector<32x64xf32>
    %cst = arith.constant dense<0.000000e+00> : vector<8x64xf32>
    %2 = tpu.matmul %0, %1, %cst {dimension_numbers = #tpu.dot_dimension_numbers<[1], [0], [0], [1], [0, 0, 1, 1], [], []>} : vector<8x32xf32>, vector<32x64xf32>, vector<8x64xf32> -> vector<8x64xf32>
    %c0_3 = arith.constant 0 : index
    %c0_4 = arith.constant 0 : index
    %3 = vector.load %arg3[%c0_3, %c0_4] : memref<1x64xf32, #tpu.memory_space<vmem>>, vector<1x64xf32>
    %4 = vector.broadcast %3 : vector<1x64xf32> to vector<8x64xf32>
    %5 = arith.addf %2, %4 : vector<8x64xf32>
    %6 = arith.mulf %5, %5 : vector<8x64xf32>
    %cst_5 = arith.constant dense<0.000000e+00> : vector<8xf32>
    %7 = vector.multi_reduction <add>, %6, %cst_5 [1] : vector<8x64xf32> to vector<8xf32>
    %8 = vector.shape_cast %7 : vector<8xf32> to vector<8x1xf32>
    %9 = math.rsqrt %8 : vector<8x1xf32>
    %10 = vector.broadcast %9 : vector<8x1xf32> to vector<8x64xf32>
    %11 = arith.mulf %5, %10 : vector<8x64xf32>
    %c0_6 = arith.constant 0 : index
    %c0_7 = arith.constant 0 : index
    %12 = vector.load %arg4[%c0_6, %c0_7] : memref<8x64xf32, #tpu.memory_space<vmem>>, vector<8x64xf32>
    tpu.vector_store %arg4[%c0_6, %c0_7], %11 {strides = array<i32>} : memref<8x64xf32, #tpu.memory_space<vmem>>, vector<8x64xf32>,
    return
  }
  func.func @transform_0(%arg0: i32) -> (i32, i32) {
    %c0_i32 = arith.constant 0 : i32
    %c0_i32_0 = arith.constant 0 : i32
    return %arg0, %c0_i32 : i32, i32
  }
  func.func @transform_1(%arg0: i32) -> (i32, i32) {
    %c0_i32 = arith.constant 0 : i32
    %c0_i32_0 = arith.constant 0 : i32
    %c0_i32_1 = arith.constant 0 : i32
    return %c0_i32, %c0_i32_0 : i32, i32
  }
  func.func @transform_2(%arg0: i32) -> (i32, i32) {
    %c0_i32 = arith.constant 0 : i32
    %c0_i32_0 = arith.constant 0 : i32
    %c0_i32_1 = arith.constant 0 : i32
    return %c0_i32, %c0_i32_0 : i32, i32
  }
  func.func @transform_3(%arg0: i32) -> (i32, i32) {
    %c0_i32 = arith.constant 0 : i32
    %c0_i32_0 = arith.constant 0 : i32
    return %arg0, %c0_i32 : i32, i32
  }
}

</mosaic_0001>

<bundles_post_ra>
// kernel: tpu_custom_call.1
= control target key start
LH: loop header
LB: loop body
LE: loop exit
PB: predicated region body
PF: predicated region fallthrough
CT: control target
= control target key end

     0   :  { %8 = vsyncpa [#allocation3], 0  ;;  %s239_s0 = inlined_call_operand.hbm [shape: f32[8,32], index: 0, kind: input, shape index: {}]   ;;  %s240_s1 = inlined_call_operand.hbm [shape: f32[32,64], index: 1, kind: input, shape index: {}]   ;;  %s241_s2 = inlined_call_operand.vmem [shape: f32[1,64], index: 2, kind: input, shape index: {}]   ;;  %s242_s3 = inlined_call_operand.hbm [shape: f32[8,64], index: 3, kind: output, shape index: {}]  }
   0x1   :  { %9 = vsyncpa [#allocation6], 0 }
   0x2   :  { %10 = vsyncpa [#allocation4], 0  ;;  %s16_s14 = sshll.u32 %s239_s0, 4  ;;  %s200_s15 = smov [#allocation2]   ;;  %s17_s14 = int_to_ptr.hbm [resolvable:$true] %s16_s14 }
   0x3   :  { %s18_s16 = sshll.u32 %s200_s15, 4  ;;  %s26_s19 = sshll.u32 %s240_s1, 4  ;;  %s19_s16 = int_to_ptr.vmem [resolvable:$true] %s18_s16  ;;  %s27_s19 = int_to_ptr.hbm [resolvable:$true] %s26_s19 }
   0x4   :  { %21 = dma.hbm_to_vmem [thread:$0]  %s17_s14, 128, %s19_s16, [#allocation3]  }
   0x5   :  { %s201_s20 = smov [#allocation5]   ;;  %s202_s22 = smov 128  }
   0x6   :  { %s28_s21 = sshll.u32 %s201_s20, 4  ;;  %s203_s23 = smov 8   ;;  %s29_s21 = int_to_ptr.vmem [resolvable:$true] %s28_s21 }
   0x7   :  { %34 = dma.hbm_to_vmem [thread:$0]  %s27_s19, 512, %s29_s21, [#allocation6], %s202_s22, %s202_s22, %s203_s23  }
   0x8   :  { %194 = dma.done.wait [#allocation3], 128  }
   0x9   :  { %195 = vsyncadd [#allocation3], 4294967168 }
   0xa   :  { %196 = dma.done.wait [#allocation6], 512  }
   0xb   :  { %197 = vsyncadd [#allocation6], 4294966784  ;;  %v49_v0 = vld [vmem:[#allocation5 + $0x18] sm:$0xff]  ;;  %v48_v1 = vld [vmem:[#allocation5 + $0x10] sm:$0xff]  ;;  %vm54_vm0 = vcmask 261120   ;;  %vm79_vm1 = vcmask 523264  }
   0xc   :  { %70 = vmatpush.msra.mxu0 %v49_v0  ;;  %v47_v2 = vld [vmem:[#allocation5 + $0x8] sm:$0xff]  ;;  %v46_v3 = vld [vmem:[#allocation5] sm:$0xff]  ;;  %v45_v4 = vld [vmem:[#allocation2] sm:$0xff]  ;;  %s204_s24 = smov [#allocation7]   ;;  %s102_s27 = sshll.u32 %s242_s3, 4  ;;  %s103_s27 = int_to_ptr.hbm [resolvable:$true] %s102_s27 }
   0xd   :  { %v119_v5 = vld [vmem:[%s241_s2] ss:$0 sm:$0xff]  ;;  %s100_s25 = sshll.u32 %s204_s24, 4  ;;  %s101_s25 = int_to_ptr.vmem [resolvable:$true] %s100_s25 }
   0xe   :  { %71 = vmatpush.msra.mxu0 %v48_v1 }
  0x10   :  { %72 = vmatpush.msra.mxu0 %v47_v2 }
  0x12   :  { %73 = vmatpush.msra.mxu0 %v46_v3 }
  0x13   :  { %113 = vmatmul.msk.f32.vlgmr.msra.gmra.mxu0 %vm54_vm0, %v45_v4 }
  0x90   :  { %v75_v6 = vpop.f32.mrf.mxu0 }
  0x91   :  { %v76_v7 = vadd.f32 %v119_v5, %v75_v6 }
  0x93   :  { %v78_v8 = vmul.f32 %v76_v7, %v76_v7 }
  0x95   :  { %v80_v9 = vsel %vm79_vm1, %v78_v8, 0.0 }
  0x96   :  { %81 = vadd.xlane.f32.xlu0 %v80_v9 }
 0x109   :  { %v82_v10 = vpop.xlane.xlu0 %81 }
 0x10a   :  { %120 = vrsqrt.f32 %v82_v10  ;;  %vm89_vm3 = vweird.f32 %v82_v10 }
 0x110   :  { %v121_v11 = vpop.eup %120 }
 0x111   :  { %v84_v12 = vmul.f32 %v121_v11, %v82_v10  ;;  %vm90_vm2 = vweird.f32 %v121_v11 }
 0x112   :  { %vm91_vm4 = vmor %vm89_vm3, %vm90_vm2 }
 0x113   :  { %v85_v13 = vmul.f32 %v121_v11, %v84_v12 }
 0x115   :  { %v86_v14 = vmul.f32 0.5, %v85_v13 }
 0x117   :  { %v87_v15 = vsub.f32 1.5, %v86_v14 }
 0x119   :  { %v88_v16 = vmul.f32 %v121_v11, %v87_v15 }
 0x11b   :  { %v92_v17 = vsel %vm91_vm4, %v121_v11, %v88_v16 }
 0x11c   :  { %v93_v18 = vmul.f32 %v92_v17, %v76_v7 }
 0x11e   :  { %94 = vst.msk [vmem:[#allocation7] sm:$0xff] %vm79_vm1, %v93_v18 }
 0x11f   :  { %105 = dma.vmem_to_hbm [thread:$0]  %s101_s25, 128, %s103_s27, [#allocation4]  }
 0x120   :  { %198 = dma.done.wait [#allocation4], 128  }
 0x121   :  { %199 = vsyncadd [#allocation4], 4294967168 }
 0x122   :  { %110 = vsyncpa [#allocation3], 1 }
 0x123   :  { %111 = vsyncpa [#allocation6], 1 }
 0x124   :  { %112 = vsyncpa [#allocation4], 1 }

</bundles_post_ra>
